<compile_context>
chip_gen: v7x
topology: tpu7x:2x2x1
jax: 0.10.0
libtpu: 0.0.40
codegen_flags: <defaults>
</compile_context>

<pallas_src>
import functools

import jax
import jax.numpy as jnp
from jax import lax
from jax.experimental import pallas as pl
from jax.experimental.pallas import tpu as pltpu


def _round_up(x, m):
    return ((x + m - 1) // m) * m


def _lora_kernel(x_ref, a_ref, b_ref, o_ref, h_ref, *, scale):
    # x_ref : (tm, in_features)   input row tile
    # a_ref : (in_features, dim)  A^T, whole, VMEM-resident (single-buffered)
    # b_ref : (dim, tn)           B^T column tile (lane-dense, 128-multiple)
    # o_ref : (tm, tn)            output tile
    # h_ref : (tm, dim)           f32 scratch, reused across the N (j) axis
    j = pl.program_id(1)

    # First (rank-reduction) matmul only once per row tile; reused per N tile.
    @pl.when(j == 0)
    def _():
        h_ref[...] = lax.dot_general(
            x_ref[...], a_ref[...],
            dimension_numbers=(((1,), (0,)), ((), ())),   # MXU-native (M,K)x(K,N)
            preferred_element_type=jnp.float32,
        )

    y = lax.dot_general(
        h_ref[...], b_ref[...].astype(jnp.float32),
        dimension_numbers=(((1,), (0,)), ((), ())),
        preferred_element_type=jnp.float32,
    )
    # Apply alpha/dim on the f32 accumulator (matches PyTorch semantics; avoids
    # re-rounding B when weights are low precision). Free on a mem-bound kernel.
    o_ref[...] = (y * scale).astype(o_ref.dtype)


def linear_adapter_forward(x, lora_a_w, lora_b_w, *, alpha=32, tm=None, tn=None):
    """x: (..., in_features) -> (..., out_features), LoRA adapter forward."""
    dim, in_features = lora_a_w.shape
    out_features, dim_b = lora_b_w.shape
    assert dim == dim_b
    scale = float(alpha) / float(dim)

    orig_shape = x.shape
    x2d = x.reshape(-1, in_features)
    M = x2d.shape[0]
    act_bytes = jnp.dtype(x.dtype).itemsize
    w_bytes = jnp.dtype(lora_b_w.dtype).itemsize

    # ---- Generation-aware VMEM budget (v7x: 64 MiB/TC, v5e/v6e: 128 MiB). ----
    try:
        vmem_cap = int(pltpu.get_tpu_info().vmem_capacity_bytes)
    except Exception:
        vmem_cap = 64 << 20          # conservative fallback: fits every generation
    vmem_budget = vmem_cap - (8 << 20)

    # ---- Tile selection. ------------------------------------------------------
    # Lane-dense N tile (multiple of 128): the whole padded out dim when small,
    # otherwise tiled so the output buffers / B tile stay VMEM-bounded.
    if tn is None:
        tn = min(2048, _round_up(out_features, 128))
    n_pad = _round_up(out_features, tn)
    grid_n = n_pad // tn

    def vmem_est(tm_c):
        return (2 * tm_c * in_features * act_bytes                 # x tile (2-buf)
                + 2 * tm_c * tn * act_bytes                        # out tile (2-buf)
                + in_features * max(dim, 128) * w_bytes            # A (single-buf)
                + (1 if grid_n == 1 else 2) * _round_up(dim, 8) * tn * w_bytes  # B
                + tm_c * max(dim, 128) * 4)                        # h scratch (f32)

    if tm is None:
        # Bigger row tiles amortize the ~0.35us per-grid-step overhead; 128 MiB
        # parts (v5e/v6e) start at 512, 64 MiB parts (v7x) at 256.
        tm_pref = 512 if vmem_cap >= (100 << 20) else 256
        tm = 8
        for cand in (512, 256, 128, 64, 32, 16, 8):
            if cand <= tm_pref and vmem_est(cand) <= vmem_budget:
                tm = cand
                break

    # Never larger than the problem; keep >= 2 row tiles when possible so the
    # "parallel" row axis can feed both TensorCores on v7x.
    m_rounded = _round_up(M, 8)
    tm_eff = min(tm, m_rounded)
    if M > 8:
        tm_eff = min(tm_eff, _round_up(pl.cdiv(M, 2), 8))
    m_pad = _round_up(M, tm_eff)
    if m_pad != M:
        x2d = jnp.pad(x2d, ((0, m_pad - M), (0, 0)))

    # ---- One-time weight layout prep (hoist per weight update in real use). ---
    # Pre-transposed so both matmuls are MXU-native; padded B columns are zero
    # and produce zero outputs that are sliced off below.
    a_t = lora_a_w.T                                   # (in_features, dim)
    b_t = lora_b_w.T                                   # (dim, out_features)
    if n_pad != out_features:
        b_t = jnp.pad(b_t, ((0, 0), (0, n_pad - out_features)))

    vmem_limit = int(min(vmem_cap, max(vmem_est(tm_eff) + (4 << 20), 16 << 20)))

    kernel = functools.partial(_lora_kernel, scale=scale)

    out = pl.pallas_call(
        kernel,
        out_shape=jax.ShapeDtypeStruct((m_pad, n_pad), x.dtype),
        grid_spec=pltpu.PrefetchScalarGridSpec(
            num_scalar_prefetch=0,
            grid=(m_pad // tm_eff, grid_n),
            in_specs=[
                pl.BlockSpec((tm_eff, in_features), lambda i, j: (i, 0)),
                # Grid-invariant, VMEM-resident: a second buffer is pure waste.
                pl.BlockSpec((in_features, dim), lambda i, j: (0, 0),
                             pipeline_mode=pl.Buffered(1)),
                pl.BlockSpec((dim, tn), lambda i, j: (0, j),
                             pipeline_mode=pl.Buffered(1) if grid_n == 1 else None),
            ],
            out_specs=pl.BlockSpec((tm_eff, tn), lambda i, j: (i, j)),
            scratch_shapes=[pltpu.VMEM((tm_eff, dim), jnp.float32)],
        ),
        compiler_params=pltpu.CompilerParams(
            dimension_semantics=("parallel", "arbitrary"),
            vmem_limit_bytes=vmem_limit,
        ),
    )(x2d, a_t, b_t)

    out = out[:M, :out_features]
    return out.reshape(*orig_shape[:-1], out_features)


if __name__ == "__main__":
    # Small, module-consistent shapes.
    batch, seq = 2, 8
    in_features, out_features, dim, alpha = 32, 64, 8, 32

    key = jax.random.PRNGKey(0)
    kx, ka, kb = jax.random.split(key, 3)

    x = jax.random.normal(kx, (batch, seq, in_features), dtype=jnp.float32)

    # lora_a: kaiming_uniform_(a=sqrt(5)) ~ U(-bound, bound), bound = 1/sqrt(in).
    bound_a = 1.0 / (in_features ** 0.5)
    lora_a_w = jax.random.uniform(
        ka, (dim, in_features), minval=-bound_a, maxval=bound_a, dtype=jnp.float32
    )
    # lora_b is zero-init in the PyTorch module; use small random values here so
    # the kernel's compute path is actually exercised (deterministic, in-script).
    lora_b_w = 0.01 * jax.random.normal(kb, (out_features, dim), dtype=jnp.float32)

    y = linear_adapter_forward(x, lora_a_w, lora_b_w, alpha=alpha)
    y = jax.block_until_ready(y)

    # Pure-JAX reference check.
    scale = alpha / dim
    y_ref = ((x @ lora_a_w.T) @ lora_b_w.T) * scale
    assert y.shape == (batch, seq, out_features)
    assert jnp.allclose(y, y_ref, atol=1e-5, rtol=1e-5)

    print("KERNEL_OK")
</pallas_src>

<mosaic_0001>
module attributes {stable_mosaic.version = 11 : i64} {
  func.func @_lora_kernel(%arg0: i32, %arg1: i32, %arg2: memref<8x32xf32, #tpu.memory_space<vmem>>, %arg3: memref<32x8xf32, #tpu.memory_space<vmem>>, %arg4: memref<8x128xf32, #tpu.memory_space<vmem>>, %arg5: memref<8x128xf32, #tpu.memory_space<vmem>>, %arg6: memref<8x8xf32, #tpu.memory_space<vmem>>) attributes {dimension_semantics = [#tpu.dimension_semantics<parallel>, #tpu.dimension_semantics<arbitrary>], iteration_bounds = array<i64: 2, 1>, scalar_prefetch = 0 : i64, scratch_operands = 1 : i64, tpu.core_type = #tpu.core_type<tc>, window_params = [{transform_indices = @transform_0, window_bounds = array<i64: 8, 32>}, {pipeline_mode = #tpu.pipeline_mode<synchronous>, transform_indices = @transform_1, window_bounds = array<i64: 32, 8>}, {pipeline_mode = #tpu.pipeline_mode<synchronous>, transform_indices = @transform_2, window_bounds = array<i64: 8, 128>}, {transform_indices = @transform_3, window_bounds = array<i64: 8, 128>}]} {
    %c0_i32 = arith.constant 0 : i32
    %0 = arith.cmpi eq, %arg1, %c0_i32 : i32
    %1 = arith.extui %0 : i1 to i32
    %c0_i32_0 = arith.constant 0 : i32
    %2 = arith.cmpi ne, %1, %c0_i32_0 : i32
    scf.if %2 {
      %c0_7 = arith.constant 0 : index
      %c0_8 = arith.constant 0 : index
      %9 = vector.load %arg2[%c0_7, %c0_8] : memref<8x32xf32, #tpu.memory_space<vmem>>, vector<8x32xf32>
      %c0_9 = arith.constant 0 : index
      %c0_10 = arith.constant 0 : index
      %10 = vector.load %arg3[%c0_9, %c0_10] : memref<32x8xf32, #tpu.memory_space<vmem>>, vector<32x8xf32>
      %cst_11 = arith.constant dense<0.000000e+00> : vector<8x8xf32>
      %11 = tpu.matmul %9, %10, %cst_11 {dimension_numbers = #tpu.dot_dimension_numbers<[1], [0], [0], [1], [0, 0, 1, 1], [], []>} : vector<8x32xf32>, vector<32x8xf32>, vector<8x8xf32> -> vector<8x8xf32>
      %c0_12 = arith.constant 0 : index
      %c0_13 = arith.constant 0 : index
      %12 = vector.load %arg6[%c0_12, %c0_13] : memref<8x8xf32, #tpu.memory_space<vmem>>, vector<8x8xf32>
      tpu.vector_store %arg6[%c0_12, %c0_13], %11 {strides = array<i32>} : memref<8x8xf32, #tpu.memory_space<vmem>>, vector<8x8xf32>,
    } else {
    }
    %c0 = arith.constant 0 : index
    %c0_1 = arith.constant 0 : index
    %3 = vector.load %arg6[%c0, %c0_1] : memref<8x8xf32, #tpu.memory_space<vmem>>, vector<8x8xf32>
    %c0_2 = arith.constant 0 : index
    %c0_3 = arith.constant 0 : index
    %4 = vector.load %arg4[%c0_2, %c0_3] : memref<8x128xf32, #tpu.memory_space<vmem>>, vector<8x128xf32>
    %cst = arith.constant dense<0.000000e+00> : vector<8x128xf32>
    %5 = tpu.matmul %3, %4, %cst {dimension_numbers = #tpu.dot_dimension_numbers<[1], [0], [0], [1], [0, 0, 1, 1], [], []>} : vector<8x8xf32>, vector<8x128xf32>, vector<8x128xf32> -> vector<8x128xf32>
    %cst_4 = arith.constant 4.000000e+00 : f32
    %6 = vector.broadcast %cst_4 : f32 to vector<8x128xf32>
    %7 = arith.mulf %5, %6 : vector<8x128xf32>
    %c0_5 = arith.constant 0 : index
    %c0_6 = arith.constant 0 : index
    %8 = vector.load %arg5[%c0_5, %c0_6] : memref<8x128xf32, #tpu.memory_space<vmem>>, vector<8x128xf32>
    tpu.vector_store %arg5[%c0_5, %c0_6], %7 {strides = array<i32>} : memref<8x128xf32, #tpu.memory_space<vmem>>, vector<8x128xf32>,
    return
  }
  func.func @transform_0(%arg0: i32, %arg1: i32) -> (i32, i32) {
    %c0_i32 = arith.constant 0 : i32
    %c0_i32_0 = arith.constant 0 : i32
    return %arg0, %c0_i32 : i32, i32
  }
  func.func @transform_1(%arg0: i32, %arg1: i32) -> (i32, i32) {
    %c0_i32 = arith.constant 0 : i32
    %c0_i32_0 = arith.constant 0 : i32
    %c0_i32_1 = arith.constant 0 : i32
    return %c0_i32, %c0_i32_0 : i32, i32
  }
  func.func @transform_2(%arg0: i32, %arg1: i32) -> (i32, i32) {
    %c0_i32 = arith.constant 0 : i32
    %c0_i32_0 = arith.constant 0 : i32
    return %c0_i32, %arg1 : i32, i32
  }
  func.func @transform_3(%arg0: i32, %arg1: i32) -> (i32, i32) {
    %c0_i32 = arith.constant 0 : i32
    return %arg0, %arg1 : i32, i32
  }
}

</mosaic_0001>

<bundles_post_ra>
// kernel: tpu_custom_call.1
= control target key start
LH: loop header
LB: loop body
LE: loop exit
PB: predicated region body
PF: predicated region fallthrough
CT: control target
= control target key end

     0   :  { %8 = vsyncpa [#allocation4], 0  ;;  %s790_s0 = inlined_call_operand.vmem [shape: f32[16,32], index: 0, kind: input, shape index: {}]   ;;  %s791_s1 = inlined_call_operand.vmem [shape: f32[32,8], index: 1, kind: input, shape index: {}]   ;;  %s792_s2 = inlined_call_operand.vmem [shape: f32[8,128], index: 2, kind: input, shape index: {}]   ;;  %s793_s3 = inlined_call_operand.hbm [shape: f32[16,128], index: 3, kind: output, shape index: {}]  }
   0x1   :  { %10 = vsyncpa [#allocation4 + $0x1], 0  ;;  %s663_s12 = smov 0   ;;  %s665_s13 = smov 0  }
   0x2   :  { %s667_s14 = smov 0   ;;  %s669_s15 = smov 0  }
   0x3   :  { %s671_s16 = smov 0   ;;  %s673_s17 = smov 0  }
   0x4 LB: > { %s458_s18 = sadd.s32 4294967295, %s637_s17   ;;  %s459_s19 = sadd.s32 4294967294, %s637_s17   ;;  %s637_s17 = sphi %s673_s17, %s16_s17   ;;  %s633_s16 = sphi %s671_s16, %s800_s16   ;;  %s629_s15 = sphi %s669_s15, %s799_s15   ;;  %s625_s14 = sphi %s667_s14, %s798_s14   ;;  %s621_s13 = sphi %s665_s13, %s797_s13   ;;  %s617_s12 = sphi %s663_s12, %s796_s12  }
   0x5   : > { %s28_s20 = sadd.s32 1, %s633_s16  ;;  %s110_s21 = sadd.s32 1, %s625_s14 }
   0x6   : > { %p30_p0 = scmp.ge.s32.totalorder %s28_s20, 2  ;;  %p120_p1 = scmp.ne.s32.totalorder %s625_s14, %s621_s13 }
   0x7   : > { %p121_p2 = scmp.eq.s32.totalorder %s458_s18, 1  ;;  %p126_p3 = scmp.ne.s32.totalorder %s621_s13, %s617_s12 }
   0x8   : > { %s802_s20 = smov (%p30_p0, %s28_s20), 0  ;;  %p127_p5 = scmp.eq.s32.totalorder %s459_s19, 1 }
   0x9   : > { %p703_p4 = por %p121_p2, %p120_p1  ;;  %s105_s23 = ssub.s32 %s633_s16, %s802_s20 }
   0xa   : > { %p463_p6 = scmp.ge.s32.totalorder %s637_s17, 1  ;;  %p108_p7 = scmp.eq.s32.totalorder %s105_s23, 0 }
   0xb   : > { %p710_p8 = por %p127_p5, %p126_p3  ;;  %p162_p9 = scmp.lt.s32.totalorder %s637_s17, 3 }
   0xc   : > { %s716_s25 = scalar_select %p108_p7, %s625_s14, %s110_s21  }
   0xd   : > { %p163_p10 = pnand %p463_p6, %p162_p9 }
   0xe   : > { %v202_v0 = vld [vmem:[%s791_s1] sm:$0xff] (!%p163_p10)  ;;  %v203_v1 = vld [vmem:[%s791_s1 + $0x8] sm:$0xff] (!%p163_p10)  ;;  %v204_v2 = vld [vmem:[%s791_s1 + $0x10] sm:$0xff] (!%p163_p10)  ;;  %v639_v3 = vmov (!%p163_p10), 0.0|0.0   ;;  %vm640_vm0 = vmmov (!%p163_p10), 0   ;;  %v641_v6 = vmov (!%p163_p10), 0.0  }
   0xf   : > { %166 = sbr.rel (%p163_p10) target bundleno = 475 (0x1db), region = 32  ;;  %495 = vmatprep.subr.bf16.mxu0 (!%p163_p10), %v639_v3  ;;  %v496_v4 = vpack.c.bf16 (!%p163_p10), %v203_v1, %v202_v0  ;;  %v205_v5 = vld [vmem:[%s791_s1 + $0x18] sm:$0xff] (!%p163_p10)  ;;  %487 = vmatprep.mubr.msk.f32.mxu0 (!%p163_p10), %vm640_vm0, %v641_v6  ;;  %p189_p11 = scmp.lt.s32.totalorder (!%p163_p10), %s629_s15, 1  ;;  %vm206_vm1 = vcmask (!%p163_p10), 261120   ;;  %v283_v9 = vld [vmem:[%s792_s2] sm:$0xff] (!%p163_p10)  ;;  %vm280_vm2 = vcmask (!%p163_p10), 64512  }
  0x10   : > { %490 = vmatprep.subr.mxu1 (!%p163_p10), %v641_v6  ;;  %492 = vmatprep.mubr.msk.f32.mxu1 (!%p163_p10), %vm640_vm0, %v641_v6  ;;  %v499_v7 = vpack.c.bf16 (!%p163_p10), %v205_v5, %v204_v2  ;;  %s186_s21 = sand.u32 (!%p163_p10), 1, %s621_s13   ;;  %s469_s26 = sshll.u32 (!%p163_p10), %s629_s15, 7 }
  0x11   : > { %497 = vmatpush3.bf16.msra.mxu0 (!%p163_p10), %v496_v4  ;;  %491 = vmatpush3.msra.mxu1 (!%p163_p10), %v283_v9  ;;  %s464_s23 = sshll.u32 (!%p163_p10), %s186_s21, 3  ;;  %s743_s4 = scalar_lea.hbm (!%p163_p10), %s793_s3, %s469_s26 }
  0x12   : > { %498 = vmatprep.subr.bf16.mxu0 (!%p163_p10), %v639_v3  ;;  %s188_s27 = scalar_lea.vmem (!%p163_p10), [#allocation3], %s464_s23  ;;  %s361_s5 = scalar_lea.sflag (!%p163_p10), [#allocation4], %s186_s21 }
  0x13   : > { %s375_s28 = sshll.u32 (!%p163_p10), %s188_s27, 4  ;;  %s745_s28 = int_to_ptr.vmem [resolvable:$true] %s375_s28 }
  0x14   : > { %s559_s6 = scalar_lea.vmem (!%p163_p10), %s745_s28, 128 }
  0x15   : > { %500 = vmatpush3.bf16.msra.mxu0 (!%p163_p10), %v499_v7  ;;  %p560_p12 = scmp.ne.s32.totalorder (!%p163_p10), %s745_s28, %s559_s6 }
  0x16   : > { %s190_s7 = scalar_select %p189_p11, %s629_s15, 1 }
  0x17   : > { %p561_p13 = pnand %p560_p12, %p703_p4  ;;  %s642_s15 = smov [#allocation3]  }
  0x18   : > { %s465_s8 = sshll.u32 %s190_s7, 3  ;;  %s563_s7 = sshll.u32 %s642_s15, 4  ;;  %s564_s7 = int_to_ptr.vmem [resolvable:$false] %s563_s7 }
  0x19   : > { %s192_s11 = scalar_lea.vmem %s790_s0, %s465_s8  ;;  %p562_p0 = pneg %p561_p13 }
  0x1a   : > { %v201_v8 = vld [vmem:[%s192_s11] sm:$0xff]  ;;  %s565_s8 = scalar_lea.vmem %s564_s7, 256  ;;  %p566_p1 = scmp.lt.s32.totalorder %s745_s28, %s564_s7 }
  0x1b   : > { %488 = vmatmul.mubr.msk.f32.vlgmr.msra.gmra.mrb[0].mxu0 %vm206_vm1, %v201_v8  ;;  %p567_p2 = scmp.lt.s32.totalorder %s565_s8, %s559_s6 }
  0x1d   : > { %p568_p3 = por %p567_p2, %p566_p1 }
  0x1f   : > { %p569_p5 = pnand %p568_p3, %p562_p0 }
  0xee   : > { %v276_v10 = vpop.f32.mrb[0].mxu0 }
  0xef   : > { %281 = vst.msk [vmem:[#allocation2] sm:$0xff] %vm280_vm2, %v276_v10  ;;  %v489_v11 = vpop.f32.mrb[1].mxu0 }
  0xf6   : > { %v282_v12 = vld [vmem:[#allocation2] sm:$0xff] }
  0xf7   : > { %493 = vmatmul.mubr.msk.f32.vlgmr.msra.gmra.mrb[0].mxu1 %vm280_vm2, %v282_v12 }
 0x1ca   : > { %v354_v13 = vpop.f32.mrb[0].mxu1 }
 0x1cb   : > { %v358_v14 = vmul.f32 4.0, %v354_v13  ;;  %v494_v15 = vpop.f32.mrb[1].mxu1 }
 0x1cd   : > { %359 = vst [vmem:[%s188_s27] sm:$0xff] %v358_v14 }
 0x1ce   : > { %572 = shalt.err (!%p569_p5)
}
 0x1cf   : > { %s573_s9 = scalar_lea.hbm %s743_s4, 128  ;;  %s577_s18 = scalar_lea.hbm %s793_s3, 256 }
 0x1d0   : > { %p574_p6 = scmp.ne.s32.totalorder %s743_s4, %s573_s9  ;;  %p578_p10 = scmp.lt.u32.totalorder %s743_s4, %s793_s3 }
 0x1d1   : > { %p579_p11 = scmp.lt.u32.totalorder %s577_s18, %s573_s9  ;;  %p581_p13 = scmp.lt.u32.totalorder %s573_s9, %s743_s4 }
 0x1d2   : > { %p575_p7 = pnand %p574_p6, %p703_p4 }
 0x1d3   : > { %p580_p12 = por %p579_p11, %p578_p10 }
 0x1d4   : > { %p576_p9 = pneg %p575_p7 }
 0x1d5   : > { %p582_p0 = por %p581_p13, %p580_p12 }
 0x1d7   : > { %p583_p1 = pnand %p582_p0, %p576_p9 }
 0x1d9   : > { %586 = shalt.err (!%p583_p1)
}
 0x1da   : > { %501 = dma.vmem_to_hbm [thread:$0]  (%p703_p4), %s745_s28, 128, %s743_s4, %s361_s5  }
 0x1db PF: > { %p507_p2 = scmp.ge.s32.totalorder %s637_s17, 2  ;;  %s387_s23 = sand.u32 1, %s617_s12  }
 0x1dc   : > { %s388_s26 = scalar_lea.sflag [#allocation4], %s387_s23 }
 0x1dd   : > { %p504_p3 = pnand %p507_p2, %p710_p8 }
 0x1df   : > { %612 = dma.done.wait (!%p504_p3), %s388_s26, 128  }
 0x1e0   : > { %614 = vsyncadd (!%p504_p3), %s388_s26, 4294967168  ;;  %s16_s17 = sadd.s32 1, %s637_s17   ;;  %s796_s12 = smov %s621_s13 }
 0x1e1   : > { %p13_p5 = scmp.ge.s32.totalorder %s16_s17, 4   ;;  %s797_s13 = smov %s625_s14 }
 0x1e2   : > { %s798_s14 = smov %s716_s25  ;;  %s799_s15 = smov %s633_s16 }
 0x1e3   : > { %s800_s16 = smov %s802_s20  ;;  %15 = sbr.rel (!%p13_p5) target bundleno = 4 (0x4), region = 74 }
 0x1ea   :  { %393 = vsyncpa [#allocation4], 1 }
 0x1eb   :  { %395 = vsyncpa [#allocation4 + $0x1], 1 }

</bundles_post_ra>
